<compile_context>
chip_gen: v7x
topology: tpu7x:2x2x1
jax: 0.10.0
libtpu: 0.0.40
codegen_flags: <defaults>
</compile_context>

<pallas_src>
import functools
from math import sqrt

import jax
import jax.numpy as jnp
from jax import lax
from jax.experimental import pallas as pl
from jax.experimental.pallas import tpu as pltpu


# -----------------------------------------------------------------------------
# Window-major head-flat relayout helpers (O(n_heads) static slices, no per-row
# ops, no lane-splitting reshapes).
#
#   torch order  : head-flat row a = r*W + j   (r = row in this head's chunk,
#                                               j = hidden_dim-wide lane window)
#   our order    : permuted row   p = j*R + r
# Softmax + attention are invariant under applying the same permutation to the
# key/value axis, and the query-axis permutation is undone in _window_merge.
# -----------------------------------------------------------------------------

def _window_major(z, n_windows, head_dim):
    """(R, W*H) -> (R*W, H); out[j*R + r, :] = z[r, j*H:(j+1)*H]."""
    return jnp.concatenate(
        [z[:, j * head_dim:(j + 1) * head_dim] for j in range(n_windows)], axis=0)


def _window_merge(zh, n_windows, rows):
    """(R*W, H) -> (R, W*H); out[r, j*H:(j+1)*H] = zh[j*R + r, :]  (torch .view merge)."""
    return jnp.concatenate(
        [zh[j * rows:(j + 1) * rows, :] for j in range(n_windows)], axis=1)


# -----------------------------------------------------------------------------
# Per-(batch, head) fused core: projections -> attention -> out-proj -> residual
# -> LayerNorm, all in VMEM.
# -----------------------------------------------------------------------------

def _head_core(xq_c, xk_c, xv_c, resid, wq_ref, wk_ref, wv_ref, wo_ref,
               gamma_ref, beta_ref, o_ref, *, n_heads, hidden_dim, causal):
    f32 = jnp.float32
    cd = xq_c.dtype                         # MXU operand dtype (bf16 by default)
    R, _ = xq_c.shape                       # rows of this head's chunk
    H = hidden_dim
    W = n_heads                             # d_model == n_heads * hidden_dim
    Sh = R * W                              # head-flat rows owned by this head

    # Bias-free Q/K/V projections for this head's row chunk (f32 accumulate).
    q = jnp.dot(xq_c, wq_ref[...], preferred_element_type=f32)     # (R, D)
    k = jnp.dot(xk_c, wk_ref[...], preferred_element_type=f32)     # (R, D)
    v = jnp.dot(xv_c, wv_ref[...], preferred_element_type=f32)     # (R, D)

    # Fold the 1/sqrt(hidden_dim) softmax scale into q (R*D elems, not Sh*Sh).
    q = q * f32(1.0 / sqrt(H))

    # Head-flat operands in window-major row order.
    qh = _window_major(q.astype(cd), W, H)                          # (Sh, H)
    kh = _window_major(k.astype(cd), W, H)                          # (Sh, H)
    vh = _window_major(v.astype(cd), W, H)                          # (Sh, H)

    # q @ k^T without materialising the transpose; energy stays f32.
    energy = lax.dot_general(qh, kh, (((1,), (1,)), ((), ())),
                             preferred_element_type=f32)            # (Sh, Sh)

    if causal:
        # torch: mask = triu(ones(Sh, Sh), 1) on head-flat indices.  Translate
        # our permuted index p = j*R + r back to head-flat a = r*W + j with a
        # handful of tiny iotas (hoisted; no per-head duplication).
        r_rows = lax.broadcasted_iota(jnp.int32, (R, 1), 0)
        a_rows = jnp.concatenate([r_rows * W + j for j in range(W)], axis=0)  # (Sh, 1)
        r_cols = lax.broadcasted_iota(jnp.int32, (1, R), 1)
        a_cols = jnp.concatenate([r_cols * W + j for j in range(W)], axis=1)  # (1, Sh)
        energy = jnp.where(a_cols > a_rows, f32(-1e20), energy)

    # Numerically stable softmax in f32; divide on the EUP (approx reciprocal).
    m = jnp.max(energy, axis=-1, keepdims=True)
    p = jnp.exp(energy - m)
    p = p * pl.reciprocal(jnp.sum(p, axis=-1, keepdims=True), approx=True)

    attn_h = jnp.dot(p.astype(cd), vh, preferred_element_type=f32)  # (Sh, H)

    # Undo the permutation == torch's `.view(B, S, d_model)` head merge.
    attn = _window_merge(attn_h, W, R)                              # (R, D)

    # Output projection + residual (dropout == identity) + LayerNorm (f32).
    y = jnp.dot(attn.astype(cd), wo_ref[...], preferred_element_type=f32)
    z = y + resid
    mean = jnp.mean(z, axis=-1, keepdims=True)
    var = jnp.mean(jnp.square(z - mean), axis=-1, keepdims=True)
    o_ref[...] = ((z - mean) * lax.rsqrt(var + f32(1e-5))
                  * gamma_ref[...] + beta_ref[...]).astype(o_ref.dtype)


def _mha_self_kernel(x_ref, wq_ref, wk_ref, wv_ref, wo_ref, gamma_ref, beta_ref,
                     o_ref, *, n_heads, hidden_dim, causal, compute_dtype):
    # Self-attention fast path: ONE activation stream (f32, also the residual).
    x = x_ref[...]
    xc = x.astype(compute_dtype)
    _head_core(xc, xc, xc, x, wq_ref, wk_ref, wv_ref, wo_ref,
               gamma_ref, beta_ref, o_ref,
               n_heads=n_heads, hidden_dim=hidden_dim, causal=causal)


def _mha_cross_kernel(xq_ref, xk_ref, xv_ref, wq_ref, wk_ref, wv_ref, wo_ref,
                      gamma_ref, beta_ref, o_ref, *, n_heads, hidden_dim, causal,
                      compute_dtype):
    # pre_query / pre_key arrive in bf16 (halved HBM read); pre_value stays f32
    # because it feeds the residual add, and is re-cast here for the V matmul.
    xv = xv_ref[...]
    _head_core(xq_ref[...], xk_ref[...], xv.astype(compute_dtype), xv,
               wq_ref, wk_ref, wv_ref, wo_ref, gamma_ref, beta_ref, o_ref,
               n_heads=n_heads, hidden_dim=hidden_dim, causal=causal)


# -----------------------------------------------------------------------------
# Wrapper: one pallas_call, grid = (batch, heads), both axes parallel.
# -----------------------------------------------------------------------------

def multi_header_attention(pre_query, pre_key, pre_value,
                           wq, wk, wv, wo, gamma, beta, *,
                           n_heads, hidden_dim, causal=False,
                           compute_dtype=jnp.bfloat16, out_dtype=jnp.float32):
    """Fused Pallas forward of MultiHeaderAttention.

    Weights are (d_model, d_model) applied as `x @ w` (= torch linear.weight.T).
    `causal=True` reproduces `mask = triu(ones) == 1`; `causal=False` is the
    `mask=None` path.  Set out_dtype=jnp.bfloat16 to halve output writeback if
    the consumer accepts it.
    """
    B, S, D = pre_query.shape
    assert pre_key.shape == (B, S, D) and pre_value.shape == (B, S, D), \
        "the module's energy@value matmul and residual require equal lengths"
    # TODO(synk): general d_model != n_heads*hidden_dim layouts (still legal for
    #             torch .view) would need a different head/row partition.
    assert D == n_heads * hidden_dim, "kernel assumes d_model == n_heads*hidden_dim"
    assert S % n_heads == 0, "seq length must divide evenly across heads"
    R = S // n_heads
    assert R % 8 == 0 or n_heads == 1, \
        "per-head row chunk (S // n_heads) must be a multiple of the 8-sublane tile"

    # bf16 weight streams (halved weight HBM traffic); LayerNorm params f32, 2-D.
    wq_c, wk_c = wq.astype(compute_dtype), wk.astype(compute_dtype)
    wv_c, wo_c = wv.astype(compute_dtype), wo.astype(compute_dtype)
    gamma2 = gamma.reshape(1, D).astype(jnp.float32)
    beta2 = beta.reshape(1, D).astype(jnp.float32)

    grid = (B, n_heads)
    chunk_spec = pl.BlockSpec((None, R, D), lambda b, h: (b, h, 0))
    w_spec = pl.BlockSpec((D, D), lambda b, h: (0, 0))
    ln_spec = pl.BlockSpec((1, D), lambda b, h: (0, 0))
    out_spec = pl.BlockSpec((None, R, D), lambda b, h: (b, h, 0))
    cparams = pltpu.CompilerParams(dimension_semantics=("parallel", "parallel"))
    out_shape = jax.ShapeDtypeStruct((B, S, D), out_dtype)

    self_attention = (pre_query is pre_key) and (pre_query is pre_value)

    if self_attention:
        kern = functools.partial(_mha_self_kernel, n_heads=n_heads,
                                 hidden_dim=hidden_dim, causal=causal,
                                 compute_dtype=compute_dtype)
        return pl.pallas_call(
            kern, out_shape=out_shape, grid=grid,
            in_specs=[chunk_spec, w_spec, w_spec, w_spec, w_spec, ln_spec, ln_spec],
            out_specs=out_spec, compiler_params=cparams,
        )(pre_query, wq_c, wk_c, wv_c, wo_c, gamma2, beta2)

    kern = functools.partial(_mha_cross_kernel, n_heads=n_heads,
                             hidden_dim=hidden_dim, causal=causal,
                             compute_dtype=compute_dtype)
    xq_c = pre_query.astype(compute_dtype)
    xk_c = pre_key.astype(compute_dtype)
    return pl.pallas_call(
        kern, out_shape=out_shape, grid=grid,
        in_specs=[chunk_spec, chunk_spec, chunk_spec,
                  w_spec, w_spec, w_spec, w_spec, ln_spec, ln_spec],
        out_specs=out_spec, compiler_params=cparams,
    )(xq_c, xk_c, pre_value, wq_c, wk_c, wv_c, wo_c, gamma2, beta2)


# -----------------------------------------------------------------------------
# Pure-JAX float32 reference with the PyTorch module's exact semantics.
# -----------------------------------------------------------------------------

def mha_reference(pre_query, pre_key, pre_value, wq, wk, wv, wo, gamma, beta, *,
                  n_heads, hidden_dim, causal):
    B, Sq, D = pre_query.shape
    q = pre_query @ wq
    k = pre_key @ wk
    v = pre_value @ wv
    qh = q.reshape(B, n_heads, -1, hidden_dim)
    kh = k.reshape(B, n_heads, -1, hidden_dim)
    vh = v.reshape(B, n_heads, -1, hidden_dim)
    energy = jnp.einsum("bhqd,bhkd->bhqk", qh, kh) / sqrt(hidden_dim)
    if causal:
        mask = jnp.triu(jnp.ones(energy.shape[-2:], jnp.float32), k=1)
        energy = jnp.where(mask == 1.0, jnp.float32(-1e20), energy)
    p = jax.nn.softmax(energy, axis=-1)
    attn = jnp.einsum("bhqk,bhkd->bhqd", p, vh).reshape(B, Sq, D)
    z = attn @ wo + pre_value                      # dropout identity
    mean = z.mean(-1, keepdims=True)
    var = ((z - mean) ** 2).mean(-1, keepdims=True)
    return (z - mean) / jnp.sqrt(var + 1e-5) * gamma + beta


# -----------------------------------------------------------------------------

if __name__ == "__main__":
    # seq chosen so S // n_heads = 16 is sublane-aligned (8 for f32, 16 for the
    # bf16 cross-path inputs); d_model = 128 keeps every block lane-dense.
    B, S = 2, 64
    n_heads, hidden_dim = 4, 32
    d_model = n_heads * hidden_dim                 # 128

    key = jax.random.PRNGKey(0)
    kx, kk, kv, kwq, kwk, kwv, kwo = jax.random.split(key, 7)
    x = jax.random.normal(kx, (B, S, d_model), jnp.float32)
    x_key = jax.random.normal(kk, (B, S, d_model), jnp.float32)
    x_val = jax.random.normal(kv, (B, S, d_model), jnp.float32)

    scale = 0.05
    wq = scale * jax.random.normal(kwq, (d_model, d_model), jnp.float32)
    wk = scale * jax.random.normal(kwk, (d_model, d_model), jnp.float32)
    wv = scale * jax.random.normal(kwv, (d_model, d_model), jnp.float32)
    wo = scale * jax.random.normal(kwo, (d_model, d_model), jnp.float32)
    gamma = jnp.ones((d_model,), jnp.float32)
    beta = jnp.zeros((d_model,), jnp.float32)

    # (1) self-attention with causal mask (mask = triu(ones) == 1 in torch);
    #     exercises the single-stream fast path.
    out_causal = multi_header_attention(
        x, x, x, wq, wk, wv, wo, gamma, beta,
        n_heads=n_heads, hidden_dim=hidden_dim, causal=True)
    out_causal = jax.block_until_ready(out_causal)
    ref_causal = mha_reference(
        x, x, x, wq, wk, wv, wo, gamma, beta,
        n_heads=n_heads, hidden_dim=hidden_dim, causal=True)

    # (2) distinct query/key/value streams, mask=None; exercises the cross path.
    out_plain = multi_header_attention(
        x, x_key, x_val, wq, wk, wv, wo, gamma, beta,
        n_heads=n_heads, hidden_dim=hidden_dim, causal=False)
    out_plain = jax.block_until_ready(out_plain)
    ref_plain = mha_reference(
        x, x_key, x_val, wq, wk, wv, wo, gamma, beta,
        n_heads=n_heads, hidden_dim=hidden_dim, causal=False)

    assert out_causal.shape == (B, S, d_model)
    assert bool(jnp.all(jnp.isfinite(out_causal)))
    assert bool(jnp.all(jnp.isfinite(out_plain)))
    # bf16 MXU operands + approximate-reciprocal softmax vs f32 reference.
    assert jnp.allclose(out_causal, ref_causal, atol=5e-2, rtol=5e-2), \
        float(jnp.max(jnp.abs(out_causal - ref_causal)))
    assert jnp.allclose(out_plain, ref_plain, atol=5e-2, rtol=5e-2), \
        float(jnp.max(jnp.abs(out_plain - ref_plain)))
    print("KERNEL_OK")
</pallas_src>

<mosaic_0001>
module attributes {stable_mosaic.version = 11 : i64} {
  func.func @_mha_self_kernel(%arg0: i32, %arg1: i32, %arg2: memref<1x16x128xf32, #tpu.memory_space<vmem>>, %arg3: memref<128x128xbf16, #tpu.memory_space<vmem>>, %arg4: memref<128x128xbf16, #tpu.memory_space<vmem>>, %arg5: memref<128x128xbf16, #tpu.memory_space<vmem>>, %arg6: memref<128x128xbf16, #tpu.memory_space<vmem>>, %arg7: memref<1x128xf32, #tpu.memory_space<vmem>>, %arg8: memref<1x128xf32, #tpu.memory_space<vmem>>, %arg9: memref<1x16x128xf32, #tpu.memory_space<vmem>>) attributes {dimension_semantics = [#tpu.dimension_semantics<parallel>, #tpu.dimension_semantics<parallel>], iteration_bounds = array<i64: 2, 4>, scalar_prefetch = 0 : i64, scratch_operands = 0 : i64, tpu.core_type = #tpu.core_type<tc>, window_params = [{transform_indices = @transform_0, window_bounds = array<i64: 1, 16, 128>}, {pipeline_mode = #tpu.pipeline_mode<synchronous>, transform_indices = @transform_1, window_bounds = array<i64: 128, 128>}, {pipeline_mode = #tpu.pipeline_mode<synchronous>, transform_indices = @transform_2, window_bounds = array<i64: 128, 128>}, {pipeline_mode = #tpu.pipeline_mode<synchronous>, transform_indices = @transform_3, window_bounds = array<i64: 128, 128>}, {pipeline_mode = #tpu.pipeline_mode<synchronous>, transform_indices = @transform_4, window_bounds = array<i64: 128, 128>}, {pipeline_mode = #tpu.pipeline_mode<synchronous>, transform_indices = @transform_5, window_bounds = array<i64: 1, 128>}, {pipeline_mode = #tpu.pipeline_mode<synchronous>, transform_indices = @transform_6, window_bounds = array<i64: 1, 128>}, {transform_indices = @transform_7, window_bounds = array<i64: 1, 16, 128>}]} {
    %c0 = arith.constant 0 : index
    %c0_0 = arith.constant 0 : index
    %c0_1 = arith.constant 0 : index
    %0 = vector.load %arg2[%c0, %c0_0, %c0_1] : memref<1x16x128xf32, #tpu.memory_space<vmem>>, vector<1x16x128xf32>
    %1 = vector.shape_cast %0 : vector<1x16x128xf32> to vector<16x128xf32>
    %2 = arith.truncf %1 : vector<16x128xf32> to vector<16x128xbf16>
    %c0_2 = arith.constant 0 : index
    %c0_3 = arith.constant 0 : index
    %3 = vector.load %arg3[%c0_2, %c0_3] : memref<128x128xbf16, #tpu.memory_space<vmem>>, vector<128x128xbf16>
    %cst = arith.constant dense<0.000000e+00> : vector<16x128xf32>
    %4 = tpu.matmul %2, %3, %cst {dimension_numbers = #tpu.dot_dimension_numbers<[1], [0], [0], [1], [0, 0, 1, 1], [], []>} : vector<16x128xbf16>, vector<128x128xbf16>, vector<16x128xf32> -> vector<16x128xf32>
    %c0_4 = arith.constant 0 : index
    %c0_5 = arith.constant 0 : index
    %5 = vector.load %arg4[%c0_4, %c0_5] : memref<128x128xbf16, #tpu.memory_space<vmem>>, vector<128x128xbf16>
    %cst_6 = arith.constant dense<0.000000e+00> : vector<16x128xf32>
    %6 = tpu.matmul %2, %5, %cst_6 {dimension_numbers = #tpu.dot_dimension_numbers<[1], [0], [0], [1], [0, 0, 1, 1], [], []>} : vector<16x128xbf16>, vector<128x128xbf16>, vector<16x128xf32> -> vector<16x128xf32>
    %c0_7 = arith.constant 0 : index
    %c0_8 = arith.constant 0 : index
    %7 = vector.load %arg5[%c0_7, %c0_8] : memref<128x128xbf16, #tpu.memory_space<vmem>>, vector<128x128xbf16>
    %cst_9 = arith.constant dense<0.000000e+00> : vector<16x128xf32>
    %8 = tpu.matmul %2, %7, %cst_9 {dimension_numbers = #tpu.dot_dimension_numbers<[1], [0], [0], [1], [0, 0, 1, 1], [], []>} : vector<16x128xbf16>, vector<128x128xbf16>, vector<16x128xf32> -> vector<16x128xf32>
    %cst_10 = arith.constant 0.176776692 : f32
    %9 = vector.broadcast %cst_10 : f32 to vector<16x128xf32>
    %10 = arith.mulf %4, %9 : vector<16x128xf32>
    %11 = arith.truncf %10 : vector<16x128xf32> to vector<16x128xbf16>
    %12 = vector.extract_strided_slice %11 {offsets = [0, 0], sizes = [16, 32], strides = [1, 1]} : vector<16x128xbf16> to vector<16x32xbf16>
    %13 = vector.extract_strided_slice %11 {offsets = [0, 32], sizes = [16, 32], strides = [1, 1]} : vector<16x128xbf16> to vector<16x32xbf16>
    %14 = vector.extract_strided_slice %11 {offsets = [0, 64], sizes = [16, 32], strides = [1, 1]} : vector<16x128xbf16> to vector<16x32xbf16>
    %15 = vector.extract_strided_slice %11 {offsets = [0, 96], sizes = [16, 32], strides = [1, 1]} : vector<16x128xbf16> to vector<16x32xbf16>
    %16 = tpu.concatenate %12, %13, %14, %15 in 0 : vector<16x32xbf16>, vector<16x32xbf16>, vector<16x32xbf16>, vector<16x32xbf16> -> vector<64x32xbf16>
    %17 = arith.truncf %6 : vector<16x128xf32> to vector<16x128xbf16>
    %18 = vector.extract_strided_slice %17 {offsets = [0, 0], sizes = [16, 32], strides = [1, 1]} : vector<16x128xbf16> to vector<16x32xbf16>
    %19 = vector.extract_strided_slice %17 {offsets = [0, 32], sizes = [16, 32], strides = [1, 1]} : vector<16x128xbf16> to vector<16x32xbf16>
    %20 = vector.extract_strided_slice %17 {offsets = [0, 64], sizes = [16, 32], strides = [1, 1]} : vector<16x128xbf16> to vector<16x32xbf16>
    %21 = vector.extract_strided_slice %17 {offsets = [0, 96], sizes = [16, 32], strides = [1, 1]} : vector<16x128xbf16> to vector<16x32xbf16>
    %22 = tpu.concatenate %18, %19, %20, %21 in 0 : vector<16x32xbf16>, vector<16x32xbf16>, vector<16x32xbf16>, vector<16x32xbf16> -> vector<64x32xbf16>
    %23 = arith.truncf %8 : vector<16x128xf32> to vector<16x128xbf16>
    %24 = vector.extract_strided_slice %23 {offsets = [0, 0], sizes = [16, 32], strides = [1, 1]} : vector<16x128xbf16> to vector<16x32xbf16>
    %25 = vector.extract_strided_slice %23 {offsets = [0, 32], sizes = [16, 32], strides = [1, 1]} : vector<16x128xbf16> to vector<16x32xbf16>
    %26 = vector.extract_strided_slice %23 {offsets = [0, 64], sizes = [16, 32], strides = [1, 1]} : vector<16x128xbf16> to vector<16x32xbf16>
    %27 = vector.extract_strided_slice %23 {offsets = [0, 96], sizes = [16, 32], strides = [1, 1]} : vector<16x128xbf16> to vector<16x32xbf16>
    %28 = tpu.concatenate %24, %25, %26, %27 in 0 : vector<16x32xbf16>, vector<16x32xbf16>, vector<16x32xbf16>, vector<16x32xbf16> -> vector<64x32xbf16>
    %cst_11 = arith.constant dense<0.000000e+00> : vector<64x64xf32>
    %29 = tpu.matmul %16, %22, %cst_11 {dimension_numbers = #tpu.dot_dimension_numbers<[1], [1], [0], [0], [0, 0, 1, 0], [], []>} : vector<64x32xbf16>, vector<64x32xbf16>, vector<64x64xf32> -> vector<64x64xf32>
    %30 = tpu.iota {dimensions = array<i32: 0>} : vector<16x1xi32>
    %c4_i32 = arith.constant 4 : i32
    %31 = vector.broadcast %c4_i32 : i32 to vector<16x1xi32>
    %32 = arith.muli %30, %31 : vector<16x1xi32>
    %c0_i32 = arith.constant 0 : i32
    %33 = vector.broadcast %c0_i32 : i32 to vector<16x1xi32>
    %34 = arith.addi %32, %33 : vector<16x1xi32>
    %c4_i32_12 = arith.constant 4 : i32
    %35 = vector.broadcast %c4_i32_12 : i32 to vector<16x1xi32>
    %36 = arith.muli %30, %35 : vector<16x1xi32>
    %c1_i32 = arith.constant 1 : i32
    %37 = vector.broadcast %c1_i32 : i32 to vector<16x1xi32>
    %38 = arith.addi %36, %37 : vector<16x1xi32>
    %c4_i32_13 = arith.constant 4 : i32
    %39 = vector.broadcast %c4_i32_13 : i32 to vector<16x1xi32>
    %40 = arith.muli %30, %39 : vector<16x1xi32>
    %c2_i32 = arith.constant 2 : i32
    %41 = vector.broadcast %c2_i32 : i32 to vector<16x1xi32>
    %42 = arith.addi %40, %41 : vector<16x1xi32>
    %c4_i32_14 = arith.constant 4 : i32
    %43 = vector.broadcast %c4_i32_14 : i32 to vector<16x1xi32>
    %44 = arith.muli %30, %43 : vector<16x1xi32>
    %c3_i32 = arith.constant 3 : i32
    %45 = vector.broadcast %c3_i32 : i32 to vector<16x1xi32>
    %46 = arith.addi %44, %45 : vector<16x1xi32>
    %47 = tpu.concatenate %34, %38, %42, %46 in 0 : vector<16x1xi32>, vector<16x1xi32>, vector<16x1xi32>, vector<16x1xi32> -> vector<64x1xi32>
    %48 = tpu.iota {dimensions = array<i32: 1>} : vector<1x16xi32>
    %c4_i32_15 = arith.constant 4 : i32
    %49 = vector.broadcast %c4_i32_15 : i32 to vector<1x16xi32>
    %50 = arith.muli %48, %49 : vector<1x16xi32>
    %c0_i32_16 = arith.constant 0 : i32
    %51 = vector.broadcast %c0_i32_16 : i32 to vector<1x16xi32>
    %52 = arith.addi %50, %51 : vector<1x16xi32>
    %c4_i32_17 = arith.constant 4 : i32
    %53 = vector.broadcast %c4_i32_17 : i32 to vector<1x16xi32>
    %54 = arith.muli %48, %53 : vector<1x16xi32>
    %c1_i32_18 = arith.constant 1 : i32
    %55 = vector.broadcast %c1_i32_18 : i32 to vector<1x16xi32>
    %56 = arith.addi %54, %55 : vector<1x16xi32>
    %c4_i32_19 = arith.constant 4 : i32
    %57 = vector.broadcast %c4_i32_19 : i32 to vector<1x16xi32>
    %58 = arith.muli %48, %57 : vector<1x16xi32>
    %c2_i32_20 = arith.constant 2 : i32
    %59 = vector.broadcast %c2_i32_20 : i32 to vector<1x16xi32>
    %60 = arith.addi %58, %59 : vector<1x16xi32>
    %c4_i32_21 = arith.constant 4 : i32
    %61 = vector.broadcast %c4_i32_21 : i32 to vector<1x16xi32>
    %62 = arith.muli %48, %61 : vector<1x16xi32>
    %c3_i32_22 = arith.constant 3 : i32
    %63 = vector.broadcast %c3_i32_22 : i32 to vector<1x16xi32>
    %64 = arith.addi %62, %63 : vector<1x16xi32>
    %65 = tpu.concatenate %52, %56, %60, %64 in 1 : vector<1x16xi32>, vector<1x16xi32>, vector<1x16xi32>, vector<1x16xi32> -> vector<1x64xi32>
    %66 = vector.broadcast %65 : vector<1x64xi32> to vector<64x64xi32>
    %67 = vector.broadcast %47 : vector<64x1xi32> to vector<64x64xi32>
    %68 = arith.cmpi sgt, %66, %67 : vector<64x64xi32>
    %cst_23 = arith.constant -1.000000e+20 : f32
    %69 = vector.broadcast %cst_23 : f32 to vector<64x64xf32>
    %70 = arith.select %68, %69, %29 : vector<64x64xi1>, vector<64x64xf32>
    %cst_24 = arith.constant dense<0xFF800000> : vector<64xf32>
    %71 = vector.multi_reduction <maximumf>, %70, %cst_24 [1] : vector<64x64xf32> to vector<64xf32>
    %72 = vector.shape_cast %71 : vector<64xf32> to vector<64x1xf32>
    %73 = vector.broadcast %72 : vector<64x1xf32> to vector<64x64xf32>
    %74 = arith.subf %70, %73 : vector<64x64xf32>
    %75 = math.exp %74 : vector<64x64xf32>
    %cst_25 = arith.constant dense<0.000000e+00> : vector<64xf32>
    %76 = vector.multi_reduction <add>, %75, %cst_25 [1] : vector<64x64xf32> to vector<64xf32>
    %77 = vector.shape_cast %76 : vector<64xf32> to vector<64x1xf32>
    %78 = tpu.reciprocal %77 {approx = true} : vector<64x1xf32> -> vector<64x1xf32>
    %79 = vector.broadcast %78 : vector<64x1xf32> to vector<64x64xf32>
    %80 = arith.mulf %75, %79 : vector<64x64xf32>
    %81 = arith.truncf %80 : vector<64x64xf32> to vector<64x64xbf16>
    %cst_26 = arith.constant dense<0.000000e+00> : vector<64x32xf32>
    %82 = tpu.matmul %81, %28, %cst_26 {dimension_numbers = #tpu.dot_dimension_numbers<[1], [0], [0], [1], [0, 0, 1, 1], [], []>} : vector<64x64xbf16>, vector<64x32xbf16>, vector<64x32xf32> -> vector<64x32xf32>
    %83 = vector.extract_strided_slice %82 {offsets = [0, 0], sizes = [16, 32], strides = [1, 1]} : vector<64x32xf32> to vector<16x32xf32>
    %84 = vector.extract_strided_slice %82 {offsets = [16, 0], sizes = [16, 32], strides = [1, 1]} : vector<64x32xf32> to vector<16x32xf32>
    %85 = vector.extract_strided_slice %82 {offsets = [32, 0], sizes = [16, 32], strides = [1, 1]} : vector<64x32xf32> to vector<16x32xf32>
    %86 = vector.extract_strided_slice %82 {offsets = [48, 0], sizes = [16, 32], strides = [1, 1]} : vector<64x32xf32> to vector<16x32xf32>
    %87 = tpu.concatenate %83, %84, %85, %86 in 1 : vector<16x32xf32>, vector<16x32xf32>, vector<16x32xf32>, vector<16x32xf32> -> vector<16x128xf32>
    %88 = arith.truncf %87 : vector<16x128xf32> to vector<16x128xbf16>
    %c0_27 = arith.constant 0 : index
    %c0_28 = arith.constant 0 : index
    %89 = vector.load %arg6[%c0_27, %c0_28] : memref<128x128xbf16, #tpu.memory_space<vmem>>, vector<128x128xbf16>
    %cst_29 = arith.constant dense<0.000000e+00> : vector<16x128xf32>
    %90 = tpu.matmul %88, %89, %cst_29 {dimension_numbers = #tpu.dot_dimension_numbers<[1], [0], [0], [1], [0, 0, 1, 1], [], []>} : vector<16x128xbf16>, vector<128x128xbf16>, vector<16x128xf32> -> vector<16x128xf32>
    %91 = arith.addf %90, %1 : vector<16x128xf32>
    %cst_30 = arith.constant dense<0.000000e+00> : vector<16xf32>
    %92 = vector.multi_reduction <add>, %91, %cst_30 [1] : vector<16x128xf32> to vector<16xf32>
    %93 = vector.shape_cast %92 : vector<16xf32> to vector<16x1xf32>
    %cst_31 = arith.constant 1.280000e+02 : f32
    %94 = vector.broadcast %cst_31 : f32 to vector<16x1xf32>
    %95 = arith.divf %93, %94 : vector<16x1xf32>
    %96 = vector.broadcast %95 : vector<16x1xf32> to vector<16x128xf32>
    %97 = arith.subf %91, %96 : vector<16x128xf32>
    %98 = arith.mulf %97, %97 : vector<16x128xf32>
    %cst_32 = arith.constant dense<0.000000e+00> : vector<16xf32>
    %99 = vector.multi_reduction <add>, %98, %cst_32 [1] : vector<16x128xf32> to vector<16xf32>
    %100 = vector.shape_cast %99 : vector<16xf32> to vector<16x1xf32>
    %cst_33 = arith.constant 1.280000e+02 : f32
    %101 = vector.broadcast %cst_33 : f32 to vector<16x1xf32>
    %102 = arith.divf %100, %101 : vector<16x1xf32>
    %103 = vector.broadcast %95 : vector<16x1xf32> to vector<16x128xf32>
    %104 = arith.subf %91, %103 : vector<16x128xf32>
    %cst_34 = arith.constant 9.99999974E-6 : f32
    %105 = vector.broadcast %cst_34 : f32 to vector<16x1xf32>
    %106 = arith.addf %102, %105 : vector<16x1xf32>
    %107 = math.rsqrt %106 : vector<16x1xf32>
    %108 = vector.broadcast %107 : vector<16x1xf32> to vector<16x128xf32>
    %109 = arith.mulf %104, %108 : vector<16x128xf32>
    %c0_35 = arith.constant 0 : index
    %c0_36 = arith.constant 0 : index
    %110 = vector.load %arg7[%c0_35, %c0_36] : memref<1x128xf32, #tpu.memory_space<vmem>>, vector<1x128xf32>
    %111 = vector.broadcast %110 : vector<1x128xf32> to vector<16x128xf32>
    %112 = arith.mulf %109, %111 : vector<16x128xf32>
    %c0_37 = arith.constant 0 : index
    %c0_38 = arith.constant 0 : index
    %113 = vector.load %arg8[%c0_37, %c0_38] : memref<1x128xf32, #tpu.memory_space<vmem>>, vector<1x128xf32>
    %114 = vector.broadcast %113 : vector<1x128xf32> to vector<16x128xf32>
    %115 = arith.addf %112, %114 : vector<16x128xf32>
    %c0_39 = arith.constant 0 : index
    %c0_40 = arith.constant 0 : index
    %c0_41 = arith.constant 0 : index
    %116 = vector.load %arg9[%c0_39, %c0_40, %c0_41] : memref<1x16x128xf32, #tpu.memory_space<vmem>>, vector<1x16x128xf32>
    %117 = vector.shape_cast %116 : vector<1x16x128xf32> to vector<16x128xf32>
    %118 = vector.shape_cast %115 : vector<16x128xf32> to vector<1x16x128xf32>
    tpu.vector_store %arg9[%c0_39, %c0_40, %c0_41], %118 {strides = array<i32>} : memref<1x16x128xf32, #tpu.memory_space<vmem>>, vector<1x16x128xf32>,
    return
  }
  func.func @transform_0(%arg0: i32, %arg1: i32) -> (i32, i32, i32) {
    %c0_i32 = arith.constant 0 : i32
    %c0_i32_0 = arith.constant 0 : i32
    return %arg0, %arg1, %c0_i32 : i32, i32, i32
  }
  func.func @transform_1(%arg0: i32, %arg1: i32) -> (i32, i32) {
    %c0_i32 = arith.constant 0 : i32
    %c0_i32_0 = arith.constant 0 : i32
    %c0_i32_1 = arith.constant 0 : i32
    return %c0_i32, %c0_i32_0 : i32, i32
  }
  func.func @transform_2(%arg0: i32, %arg1: i32) -> (i32, i32) {
    %c0_i32 = arith.constant 0 : i32
    %c0_i32_0 = arith.constant 0 : i32
    %c0_i32_1 = arith.constant 0 : i32
    return %c0_i32, %c0_i32_0 : i32, i32
  }
  func.func @transform_3(%arg0: i32, %arg1: i32) -> (i32, i32) {
    %c0_i32 = arith.constant 0 : i32
    %c0_i32_0 = arith.constant 0 : i32
    %c0_i32_1 = arith.constant 0 : i32
    return %c0_i32, %c0_i32_0 : i32, i32
  }
  func.func @transform_4(%arg0: i32, %arg1: i32) -> (i32, i32) {
    %c0_i32 = arith.constant 0 : i32
    %c0_i32_0 = arith.constant 0 : i32
    %c0_i32_1 = arith.constant 0 : i32
    return %c0_i32, %c0_i32_0 : i32, i32
  }
  func.func @transform_5(%arg0: i32, %arg1: i32) -> (i32, i32) {
    %c0_i32 = arith.constant 0 : i32
    %c0_i32_0 = arith.constant 0 : i32
    %c0_i32_1 = arith.constant 0 : i32
    return %c0_i32, %c0_i32_0 : i32, i32
  }
  func.func @transform_6(%arg0: i32, %arg1: i32) -> (i32, i32) {
    %c0_i32 = arith.constant 0 : i32
    %c0_i32_0 = arith.constant 0 : i32
    %c0_i32_1 = arith.constant 0 : i32
    return %c0_i32, %c0_i32_0 : i32, i32
  }
  func.func @transform_7(%arg0: i32, %arg1: i32) -> (i32, i32, i32) {
    %c0_i32 = arith.constant 0 : i32
    %c0_i32_0 = arith.constant 0 : i32
    return %arg0, %arg1, %c0_i32 : i32, i32, i32
  }
}

</mosaic_0001>

<bundles_post_ra>
// kernel: tpu_custom_call.1
= control target key start
LH: loop header
LB: loop body
LE: loop exit
PB: predicated region body
PF: predicated region fallthrough
CT: control target
= control target key end

     0   :  { %s2615_s0 = inlined_call_operand.hbm [shape: f32[2,64,128], index: 0, kind: input, shape index: {}]   ;;  %s2616_s1 = inlined_call_operand.hbm [shape: bf16[128,128], index: 1, kind: input, shape index: {}]   ;;  %s2617_s2 = inlined_call_operand.hbm [shape: bf16[128,128], index: 2, kind: input, shape index: {}]   ;;  %s2618_s3 = inlined_call_operand.hbm [shape: bf16[128,128], index: 3, kind: input, shape index: {}]   ;;  %s2619_s4 = inlined_call_operand.hbm [shape: bf16[128,128], index: 4, kind: input, shape index: {}]   ;;  %s2620_s5 = inlined_call_operand.vmem [shape: f32[1,128], index: 5, kind: input, shape index: {}]   ;;  %s2621_s6 = inlined_call_operand.vmem [shape: f32[1,128], index: 6, kind: input, shape index: {}]   ;;  %s2622_s7 = inlined_call_operand.hbm [shape: f32[2,64,128], index: 7, kind: output, shape index: {}]  }
   0x1   :  { %2630 = sst [smem:[#allocation19_spill]] %s2616_s1 }
   0x2   :  { %2631 = sst [smem:[#allocation20_spill]] %s2617_s2 }
   0x3   :  { %2632 = sst [smem:[#allocation21_spill]] %s2618_s3 }
   0x4   :  { %2633 = sst [smem:[#allocation22_spill]] %s2620_s5 }
   0x5   :  { %2634 = sst [smem:[#allocation23_spill]] %s2621_s6 }
   0x6   :  { %2635 = sst [smem:[#allocation24_spill]] %s2622_s7 }
   0x7   :  { %12 = vsyncpa [#allocation3], 0 }
   0x8   :  { %14 = vsyncpa [#allocation3 + $0x1], 0 }
   0x9   :  { %15 = vsyncpa [#allocation6], 0 }
   0xa   :  { %16 = vsyncpa [#allocation9], 0 }
   0xb   :  { %17 = vsyncpa [#allocation4], 0 }
   0xc   :  { %19 = vsyncpa [#allocation4 + $0x1], 0  ;;  %s2142_s24 = smov 0   ;;  %s2144_s25 = smov 0  }
   0xd   :  { %s2146_s26 = smov 0   ;;  %s2148_s27 = smov 0  }
   0xe   :  { %s2150_s28 = smov 0   ;;  %s2152_s29 = smov 0  }
   0xf   :  { %s2154_s30 = smov 0   ;;  %s2156_s8 = smov 0  }
  0x10 LB: > { %2636 = sst [smem:[#allocation16_spill]] %s2052_s24  ;;  %s1379_s9 = sadd.s32 4294967295, %s2080_s8   ;;  %s2080_s8 = sphi %s2156_s8, %s25_s8   ;;  %s2076_s30 = sphi %s2154_s30, %s2670_s30   ;;  %s2072_s29 = sphi %s2152_s29, %s2669_s29   ;;  %s2068_s28 = sphi %s2150_s28, %s2668_s28   ;;  %s2064_s27 = sphi %s2148_s27, %s2667_s27   ;;  %s2060_s26 = sphi %s2146_s26, %s2666_s26   ;;  %s2056_s25 = sphi %s2144_s25, %s2665_s25   ;;  %s2052_s24 = sphi %s2142_s24, %s2664_s24  }
  0x11   : > { %2637 = sst [smem:[#allocation17_spill]] %s2068_s28  ;;  %s1380_s10 = sadd.s32 4294967294, %s2080_s8  }
  0x12   : > { %p59_p0 = scmp.ne.s32.totalorder %s2056_s25, %s2052_s24  ;;  %p2186_p1 = scmp.eq.s32.totalorder %s1379_s9, 0 }
  0x13   : > { %p2190_p2 = scmp.eq.s32.totalorder %s1379_s9, 7  ;;  %p217_p3 = scmp.eq.s32.totalorder %s1380_s10, 7 }
  0x14   : > { %s2638_s11 = scalar_select %p2186_p1, 1, 0 }
  0x15   : > { %s2639_s12 = scalar_select %p2190_p2, 1, 0 }
  0x16   : > { %p2196_p4 = por %p2186_p1, %p59_p0  ;;  %p1381_p5 = scmp.ge.s32.totalorder %s2080_s8, 1 }
  0x17   : > { %p2201_p6 = por %p217_p3, %p59_p0  ;;  %p224_p7 = scmp.lt.s32.totalorder %s2080_s8, 9 }
  0x18   : > { %s2640_s13 = scalar_select %p2196_p4, 1, 0 }
  0x19   : > { %s2641_s14 = scalar_select %p2201_p6, 1, 0 }
  0x1a   : > { %p2206_p8 = pnand %p1381_p5, %p224_p7  ;;  %s2082_s16 = smov [#allocation5]  }
  0x1b   : > { %2642 = sst [smem:[#allocation18_spill]] %s2641_s14  ;;  %s236_s17 = sshll.u32 %s2082_s16, 4  ;;  %s2210_s17 = int_to_ptr.vmem [resolvable:$true] %s236_s17 }
  0x1c   : > { %s2643_s15 = scalar_select %p2206_p8, 1, 0 }
  0x1d   : > { %p1634_p9 = pneg %p2206_p8  ;;  %s2083_s19 = smov [#allocation8]  }
  0x1e   : > { %s262_s20 = sshll.u32 %s2083_s19, 4  ;;  %s2084_s21 = smov [#allocation7]   ;;  %s2220_s20 = int_to_ptr.vmem [resolvable:$true] %s262_s20 }
  0x1f   : > { %p2216_p10 = pnand %p1634_p9, %p2186_p1  ;;  %s2222_s22 = sshll.u32 %s2084_s21, 4  ;;  %s250_s22 = int_to_ptr.vmem [resolvable:$true] %s2222_s22 }
  0x20   : > { %s2645_s1 = sld [smem:[#allocation19_spill]] }
  0x21   : > { %p2232_p12 = pneg %p2216_p10 }
  0x26   : > { %s1832_s10 = scalar_lea.hbm %s2645_s1, 1024 }
  0x27   : > { %p1833_p11 = scmp.ne.s32.totalorder %s2645_s1, %s1832_s10  ;;  %p1839_p3 = scmp.lt.u32.totalorder %s1832_s10, %s2645_s1 }
  0x29   : > { %p1835_p13 = pnand %p2232_p12, %p1833_p11 }
  0x2b   : > { %p1836_p0 = pneg %p1835_p13 }
  0x2d   : > { %p1841_p5 = pnand %p1839_p3, %p1836_p0 }
  0x2f   : > { %1844 = shalt.err (!%p1841_p5)
}
  0x30   : > { %s1845_s14 = scalar_lea.vmem %s2210_s17, 1024  ;;  %p1853_p1 = scmp.lt.s32.totalorder %s2210_s17, %s2210_s17 }
  0x31   : > { %p1846_p7 = scmp.ne.s32.totalorder %s2210_s17, %s1845_s14  ;;  %p1854_p4 = scmp.lt.s32.totalorder %s1845_s14, %s1845_s14 }
  0x33   : > { %p1848_p9 = pnand %p1846_p7, %p2232_p12  ;;  %p1855_p11 = por %p1854_p4, %p1853_p1 }
  0x35   : > { %p1849_p6 = pneg %p1848_p9 }
  0x37   : > { %p1856_p13 = pnand %p1855_p11, %p1849_p6 }
  0x39   : > { %1859 = shalt.err (!%p1856_p13)
}
  0x3a   : > { %s2085_s23 = smov 64   ;;  %s2086_s9 = smov 4  }
  0x3b   : > { %1637 = dma.hbm_to_vmem [thread:$0]  (!%p2216_p10), %s2645_s1, 1024, %s2210_s17, [#allocation6], %s2085_s23, %s2085_s23, %s2086_s9  }
  0x3c   : > { %s2647_s3 = sld [smem:[#allocation21_spill]] }
  0x42   : > { %s1860_s14 = scalar_lea.hbm %s2647_s3, 1024 }
  0x43   : > { %p1861_p1 = scmp.ne.s32.totalorder %s2647_s3, %s1860_s14  ;;  %p1867_p0 = scmp.lt.u32.totalorder %s1860_s14, %s2647_s3 }
  0x45   : > { %p1863_p4 = pnand %p1861_p1, %p2232_p12 }
  0x47   : > { %p1864_p6 = pneg %p1863_p4 }
  0x49   : > { %p1869_p3 = pnand %p1867_p0, %p1864_p6 }
  0x4b   : > { %1872 = shalt.err (!%p1869_p3)
}
  0x4c   : > { %s1873_s17 = scalar_lea.vmem %s2220_s20, 1024  ;;  %p1881_p11 = scmp.lt.s32.totalorder %s2220_s20, %s2220_s20 }
  0x4d   : > { %p1874_p5 = scmp.ne.s32.totalorder %s2220_s20, %s1873_s17  ;;  %p1882_p13 = scmp.lt.s32.totalorder %s1873_s17, %s1873_s17 }
  0x4f   : > { %p1876_p7 = pnand %p1874_p5, %p2232_p12  ;;  %p1883_p1 = por %p1882_p13, %p1881_p11 }
  0x51   : > { %p1877_p9 = pneg %p1876_p7 }
  0x53   : > { %p1884_p4 = pnand %p1883_p1, %p1877_p9 }
  0x55   : > { %1887 = shalt.err (!%p1884_p4)
}
  0x56   : > { %1643 = dma.hbm_to_vmem [thread:$0]  (!%p2216_p10), %s2647_s3, 1024, %s2220_s20, [#allocation9], %s2085_s23, %s2085_s23, %s2086_s9  }
  0x57   : > { %s2648_s2 = sld [smem:[#allocation20_spill]] }
  0x5d   : > { %s1888_s10 = scalar_lea.hbm %s2648_s2, 1024 }
  0x5e   : > { %p1889_p6 = scmp.ne.s32.totalorder %s2648_s2, %s1888_s10  ;;  %p1895_p5 = scmp.lt.u32.totalorder %s1888_s10, %s2648_s2 }
  0x60   : > { %p1891_p0 = pnand %p1889_p6, %p2232_p12 }
  0x62   : > { %p1892_p3 = pneg %p1891_p0 }
  0x64   : > { %p1897_p7 = pnand %p1895_p5, %p1892_p3 }
  0x66   : > { %1900 = shalt.err (!%p1897_p7)
}
  0x67   : > { %s1901_s17 = scalar_lea.vmem %s250_s22, 1024  ;;  %p1909_p1 = scmp.lt.s32.totalorder %s250_s22, %s250_s22 }
  0x68   : > { %p1902_p9 = scmp.ne.s32.totalorder %s250_s22, %s1901_s17  ;;  %p1910_p4 = scmp.lt.s32.totalorder %s1901_s17, %s1901_s17 }
  0x6a   : > { %p1904_p11 = pnand %p1902_p9, %p2232_p12  ;;  %p1911_p8 = por %p1910_p4, %p1909_p1 }
  0x6c   : > { %p1905_p13 = pneg %p1904_p11 }
  0x6e   : > { %p1912_p2 = pnand %p1911_p8, %p1905_p13 }
  0x70   : > { %1915 = shalt.err (!%p1912_p2)
}
  0x71   : > { %1640 = dma.hbm_to_vmem [thread:$0]  (!%p2216_p10), %s2648_s2, 1024, %s250_s22, [#allocation6], %s2085_s23, %s2085_s23, %s2086_s9  }
  0x72   : > { %s2087_s6 = smov [#allocation10]   ;;  %s1916_s16 = scalar_lea.hbm %s2619_s4, 1024 }
  0x73   : > { %s275_s7 = sshll.u32 %s2087_s6, 4  ;;  %p1917_p2 = scmp.ne.s32.totalorder %s2619_s4, %s1916_s16  ;;  %s276_s7 = int_to_ptr.vmem [resolvable:$true] %s275_s7 }
  0x74   : > { %p1923_p0 = scmp.lt.u32.totalorder %s1916_s16, %s2619_s4 }
  0x75   : > { %p1919_p8 = pnand %p1917_p2, %p2232_p12 }
  0x77   : > { %p1920_p6 = pneg %p1919_p8 }
  0x79   : > { %p1925_p3 = pnand %p1923_p0, %p1920_p6 }
  0x7b   : > { %1928 = shalt.err (!%p1925_p3)
}
  0x7c   : > { %s1929_s22 = scalar_lea.vmem %s276_s7, 1024  ;;  %p1937_p11 = scmp.lt.s32.totalorder %s276_s7, %s276_s7 }
  0x7d   : > { %p1930_p5 = scmp.ne.s32.totalorder %s276_s7, %s1929_s22  ;;  %p1938_p13 = scmp.lt.s32.totalorder %s1929_s22, %s1929_s22 }
  0x7f   : > { %p1932_p7 = pnand %p1930_p5, %p2232_p12  ;;  %p1939_p1 = por %p1938_p13, %p1937_p11 }
  0x81   : > { %p1933_p9 = pneg %p1932_p7 }
  0x83   : > { %p1940_p4 = pnand %p1939_p1, %p1933_p9 }
  0x85   : > { %1943 = shalt.err (!%p1940_p4)
}
  0x86   : > { %1646 = dma.hbm_to_vmem [thread:$0]  (!%p2216_p10), %s2619_s4, 1024, %s276_s7, [#allocation9], %s2085_s23, %s2085_s23, %s2086_s9  }
  0x87   : > { %s34_s24 = sadd.s32 1, %s2072_s29  ;;  %s37_s18 = sadd.s32 1, %s2076_s30 }
  0x88   : > { %p35_p12 = scmp.ge.s32.totalorder %s34_s24, 4  ;;  %s46_s6 = sadd.s32 1, %s2060_s26 }
  0x89   : > { %p53_p2 = scmp.ne.s32.totalorder %s2060_s26, %s2056_s25  ;;  %p54_p8 = scmp.eq.s32.totalorder %s2080_s8, 0 }
  0x8a   : > { %s2672_s24 = smov (%p35_p12, %s34_s24), 0  ;;  %s2674_s18 = smov (!%p35_p12, %s37_s18), %s2076_s30 }
  0x8b   : > { %s42_s28 = ssub.s32 %s2072_s29, %s2672_s24  ;;  %p2336_p6 = por %p54_p8, %p53_p2 }
  0x8c   : > { %p39_p10 = scmp.ge.s32.totalorder %s2674_s18, 2  ;;  %p2650_p0 = scmp.ne.s32.totalorder %s2639_s12, 0 }
  0x8d   : > { %p1659_p5 = scmp.lt.s32.totalorder %s2080_s8, 8  ;;  %s295_s9 = sand.u32 1, %s2060_s26  }
  0x8e   : > { %p2342_p3 = por %p2650_p0, %p53_p2  ;;  %s2676_s18 = smov (%p39_p10, %s2674_s18), 0 }
  0x8f   : > { %s1387_s7 = sshll.u32 %s295_s9, 4  ;;  %s41_s16 = ssub.s32 %s2076_s30, %s2676_s18 }
  0x90   : > { %s43_s19 = sor.u32 %s42_s28, %s41_s16  ;;  %s1388_s21 = sshll.u32 %s2072_s29, 1 }
  0x91   : > { %p44_p7 = scmp.eq.s32.totalorder %s43_s19, 0  ;;  %s1389_s14 = sshll.u32 %s2076_s30, 3 }
  0x92   : > { %s305_s17 = sadd.s32 %s1389_s14, %s1388_s21  ;;  %s299_s22 = scalar_lea.vmem [#allocation2], %s1387_s7 }
  0x93   : > { %s308_s12 = sshll.u32 %s299_s22, 4  ;;  %s1390_s5 = sshll.u32 %s305_s17, 7  ;;  %s2357_s12 = int_to_ptr.vmem [resolvable:$true] %s308_s12 }
  0x94   : > { %s2355_s20 = scalar_select %p44_p7, %s2060_s26, %s46_s6  }
  0x95   : > { %s2362_s3 = scalar_lea.hbm %s2615_s0, %s1390_s5  ;;  %p2368_p9 = pnand %p1659_p5, %p2336_p6 }
  0x96   : > { %s2372_s6 = scalar_lea.sflag [#allocation3], %s295_s9  ;;  %s1944_s7 = scalar_lea.hbm %s2362_s3, 256 }
  0x97   : > { %p1945_p11 = scmp.ne.s32.totalorder %s2362_s3, %s1944_s7  ;;  %p1946_p13 = pneg %p2368_p9 }
  0x98   : > { %s1949_s10 = scalar_lea.hbm %s2615_s0, 2048  ;;  %p1950_p12 = scmp.lt.u32.totalorder %s2362_s3, %s2615_s0 }
  0x99   : > { %p1947_p1 = pnand %p1946_p13, %p1945_p11  ;;  %p1951_p2 = scmp.lt.u32.totalorder %s1949_s10, %s1944_s7 }
  0x9a   : > { %p1953_p6 = scmp.lt.u32.totalorder %s1944_s7, %s2362_s3 }
  0x9b   : > { %p1948_p4 = pneg %p1947_p1  ;;  %p1952_p8 = por %p1951_p2, %p1950_p12 }
  0x9d   : > { %p1954_p10 = por %p1953_p6, %p1952_p8 }
  0x9f   : > { %p1955_p0 = pnand %p1954_p10, %p1948_p4 }
  0xa1   : > { %1958 = shalt.err (!%p1955_p0)
}
  0xa2   : > { %s1959_s9 = scalar_lea.vmem %s2357_s12, 256  ;;  %s2088_s21 = smov [#allocation2]  }
  0xa3   : > { %p1960_p5 = scmp.ne.s32.totalorder %s2357_s12, %s1959_s9  ;;  %s1964_s14 = sshll.u32 %s2088_s21, 4  ;;  %s1965_s14 = int_to_ptr.vmem [resolvable:$false] %s1964_s14 }
  0xa4   : > { %s1966_s17 = scalar_lea.vmem %s1965_s14, 512  ;;  %p1967_p1 = scmp.lt.s32.totalorder %s2357_s12, %s1965_s14 }
  0xa5   : > { %p1962_p7 = pnand %p1960_p5, %p1946_p13  ;;  %p1968_p12 = scmp.lt.s32.totalorder %s1966_s17, %s1959_s9 }
  0xa7   : > { %p1963_p11 = pneg %p1962_p7  ;;  %p1969_p2 = por %p1968_p12, %p1967_p1 }
  0xa9   : > { %p1970_p8 = pnand %p1969_p2, %p1963_p11 }
  0xab   : > { %1973 = shalt.err (!%p1970_p8)
}
  0xac   : > { %s2089_s22 = smov 128   ;;  %s2090_s5 = smov 8  }
  0xad   : > { %1650 = dma.hbm_to_vmem [thread:$0]  (!%p2368_p9), %s2362_s3, 256, %s2357_s12, %s2372_s6, %s2089_s22, %s2089_s22, %s2090_s5  }
  0xae   : > { %p2653_p13 = scmp.ne.s32.totalorder %s2643_s15, 0 }
  0xaf   : > { %s2403_s7 = sand.u32 (!%p2653_p13), 1, %s2056_s25   ;;  %p2654_p4 = scmp.ne.s32.totalorder (!%p2653_p13), %s2640_s13, 0 }
  0xb0   : > { %320 = sbr.rel (%p2653_p13) target bundleno = 2015 (0x7df), region = 48  ;;  %s1392_s1 = sshll.u32 (!%p2653_p13), %s2403_s7, 4 }
  0xb1   : > { %s323_s2 = scalar_lea.sflag (!%p2653_p13), [#allocation3], %s2403_s7  ;;  %s2409_s10 = scalar_lea.vmem (!%p2653_p13), [#allocation2], %s1392_s1 }
  0xb7   : > { %2035 = dma.done.wait (%p2654_p4), %s323_s2, 256  }
  0xb8   : > { %2037 = vsyncadd (%p2654_p4), %s323_s2, 4294967040  ;;  %p2655_p9 = scmp.ne.s32.totalorder %s2638_s11, 0 }
  0xba   : > { %2039 = dma.done.wait (%p2655_p9), [#allocation6], 2048  }
  0xbb   : > { %2041 = vsyncadd (%p2655_p9), [#allocation6], 4294965248 }
  0xbc   : > { %2043 = dma.done.wait (%p2655_p9), [#allocation9], 2048  }
  0xbd   : > { %2045 = vsyncadd (%p2655_p9), [#allocation9], 4294965248  ;;  %v2091_v0 = vmov 0.0   ;;  %vm2092_vm0 = vmmov 0   ;;  %v1764_v1 = vld [vmem:[#allocation7] sm:$0xff]   ;;  %v1765_v2 = vld [vmem:[#allocation7 + $0x8] sm:$0xff]   ;;  %v813_v33 = vlaneseq }
  0xbe   : > { %1518 = vmatprep.subr.bf16.mxu1 %v2091_v0  ;;  %1498 = vmatprep.subr.bf16.mxu0 %v2091_v0  ;;  %v1768_v3 = vld [vmem:[#allocation5] sm:$0xff]   ;;  %v1766_v4 = vld [vmem:[#allocation7 + $0x10] sm:$0xff]   ;;  %v1770_v5 = vld [vmem:[#allocation5 + $0x8] sm:$0xff]   ;;  %vm723_vm1 = vcmask 261120   ;;  %s2093_s3 = smov 32   ;;  %s2094_s11 = smov 96  }
  0xbf   : > { %1534 = vmatprep.mubr.msk.bf16.mxu1 %vm2092_vm0, %v2091_v0  ;;  %1514 = vmatprep.mubr.msk.bf16.mxu0 %vm2092_vm0, %v2091_v0  ;;  %v1767_v6 = vld [vmem:[#allocation7 + $0x18] sm:$0xff]   ;;  %v1772_v7 = vld [vmem:[#allocation5 + $0x10] sm:$0xff]   ;;  %v1769_v8 = vld [vmem:[#allocation7 + $0x20] sm:$0xff]   ;;  %s2095_s13 = smov 64   ;;  %v2096_v35 = vmov 0   ;;  %v2467_v36 = vshrl.u32 %v813_v33, 7 }
  0xc0   : > { %1519 = vmatpush3.bf16.msra.mxu1 %v1764_v1  ;;  %1499 = vmatpush3.bf16.msra.mxu0 %v1768_v3  ;;  %v1774_v9 = vld [vmem:[#allocation5 + $0x18] sm:$0xff]   ;;  %v1771_v10 = vld [vmem:[#allocation7 + $0x28] sm:$0xff]   ;;  %v1776_v11 = vld [vmem:[#allocation5 + $0x20] sm:$0xff]   ;;  %v825_v40 = vand.u32 127, %v813_v33  ;;  %s2097_s15 = smov 16   ;;  %s2098_s12 = smov 48  }
  0xc1   : > { %1520 = vmatprep.subr.bf16.mxu1 %v2091_v0  ;;  %1500 = vmatprep.subr.bf16.mxu0 %v2091_v0  ;;  %v1773_v12 = vld [vmem:[#allocation7 + $0x30] sm:$0xff]   ;;  %v1777_v13 = vld [vmem:[#allocation5 + $0x28] sm:$0xff]   ;;  %v1775_v14 = vld [vmem:[#allocation7 + $0x38] sm:$0xff]   ;;  %v815_v38 = vadd.s32 8, %v2467_v36  ;;  %v816_v39 = vmul.u32 4, %v2467_v36  ;;  %vm836_vm2 = vcmask 130048  }
  0xc2   : > { %v2441_v15 = vld [vmem:[%s2409_s10] sm:$0xff]  ;;  %v2444_v16 = vld [vmem:[%s2409_s10 + $0x8] sm:$0xff]  ;;  %1748 = vset.pattern.permute.xlu1 %v2096_v35  ;;  %1747 = vset.pattern.permute.xlu0 %v2096_v35  ;;  %v2473_v44 = vmul.u32 4, %v825_v40  ;;  %vm839_vm3 = vcmask 392192   ;;  %vm885_vm5 = vcmask 523264   ;;  %vm1083_vm13 = vcmask 785408  }
  0xc3   : > { %v1778_v17 = vld [vmem:[#allocation5 + $0x30] sm:$0xff]   ;;  %v2450_v18 = vpack.c.bf16 %v2444_v16, %v2441_v15  ;;  %v1779_v19 = vld [vmem:[#allocation5 + $0x38] sm:$0xff]   ;;  %v1780_v34 = vld [vmem:[#allocation8] sm:$0xff]   ;;  %v817_v41 = vmul.u32 4, %v815_v38  ;;  %v818_v43 = vadd.s32 1, %v816_v39  ;;  %v820_v49 = vadd.s32 2, %v816_v39 }
  0xc4   : > { %1521 = vmatpush3.bf16.msra.mxu1 %v1765_v2  ;;  %1501 = vmatpush3.bf16.msra.mxu0 %v1770_v5  ;;  %v1781_v37 = vld [vmem:[#allocation8 + $0x8] sm:$0xff]   ;;  %v1782_v42 = vld [vmem:[#allocation8 + $0x10] sm:$0xff]   ;;  %v828_v46 = vadd.s32 2, %v2473_v44  ;;  %v1783_v47 = vld [vmem:[#allocation8 + $0x18] sm:$0xff]   ;;  %v827_v48 = vadd.s32 1, %v2473_v44  ;;  %v829_v51 = vadd.s32 3, %v2473_v44 }
  0xc5   : > { %1522 = vmatprep.subr.bf16.mxu1 %v2091_v0  ;;  %1502 = vmatprep.subr.bf16.mxu0 %v2091_v0  ;;  %v819_v45 = vadd.s32 1, %v817_v41  ;;  %v1784_v50 = vld [vmem:[#allocation8 + $0x20] sm:$0xff]   ;;  %v822_v52 = vadd.s32 3, %v816_v39  ;;  %v1785_v53 = vld [vmem:[#allocation8 + $0x28] sm:$0xff]   ;;  %v821_v54 = vadd.s32 2, %v817_v41  ;;  %v1786_v55 = vld [vmem:[#allocation8 + $0x30] sm:$0xff]  }
  0xc6   : > { %v823_v56 = vadd.s32 3, %v817_v41  ;;  %v1787_v57 = vld [vmem:[#allocation8 + $0x38] sm:$0xff]   ;;  %s2656_s28 = sld [smem:[#allocation17_spill]]  ;;  %s1441_s6 = sshll.u32 %s2064_s27, 1 }
  0xc7   : > { %s2657_s21 = sld [smem:[#allocation22_spill]]  ;;  %s2658_s22 = sld [smem:[#allocation23_spill]] }
  0xc8   : > { %1523 = vmatpush3.bf16.msra.mxu1 %v1766_v4  ;;  %1503 = vmatpush3.bf16.msra.mxu0 %v1772_v7  ;;  %s372_s27 = scalar_lea.vmem [#allocation11], %s1392_s1  ;;  %s2099_s1 = smov [#allocation11]  }
  0xc9   : > { %1524 = vmatprep.subr.bf16.mxu1 %v2091_v0  ;;  %1504 = vmatprep.subr.bf16.mxu0 %v2091_v0  ;;  %s1251_s10 = sshll.u32 %s372_s27, 4  ;;  %s2561_s10 = int_to_ptr.vmem [resolvable:$true] %s1251_s10 }
  0xcc   : > { %1525 = vmatpush3.bf16.msra.mxu1 %v1767_v6  ;;  %1505 = vmatpush3.bf16.msra.mxu0 %v1774_v9  ;;  %s1442_s16 = sshll.u32 %s2656_s28, 3  ;;  %s1974_s28 = scalar_lea.vmem %s2561_s10, 256 }
  0xcd   : > { %1526 = vmatprep.subr.bf16.mxu1 %v2091_v0  ;;  %1506 = vmatprep.subr.bf16.mxu0 %v2091_v0  ;;  %s1248_s5 = sadd.s32 %s1442_s16, %s1441_s6  ;;  %p1975_p6 = scmp.ne.s32.totalorder %s2561_s10, %s1974_s28 }
  0xce   : > { %s1443_s2 = sshll.u32 %s1248_s5, 7  ;;  %s1978_s6 = sshll.u32 %s2099_s1, 4  ;;  %s1979_s6 = int_to_ptr.vmem [resolvable:$false] %s1978_s6 }
  0xcf   : > { %p1976_p10 = pnand %p1975_p6, %p2342_p3  ;;  %s1980_s16 = scalar_lea.vmem %s1979_s6, 512 }
  0xd0   : > { %1527 = vmatpush3.bf16.msra.mxu1 %v1769_v8  ;;  %1507 = vmatpush3.bf16.msra.mxu0 %v1776_v11  ;;  %p1981_p5 = scmp.lt.s32.totalorder %s2561_s10, %s1979_s6  ;;  %p1982_p7 = scmp.lt.s32.totalorder %s1980_s16, %s1974_s28 }
  0xd1   : > { %1528 = vmatprep.subr.bf16.mxu1 %v2091_v0  ;;  %1508 = vmatprep.subr.bf16.mxu0 %v2091_v0  ;;  %p1977_p0 = pneg %p1976_p10 }
  0xd2   : > { %p1983_p11 = por %p1982_p7, %p1981_p5 }
  0xd4   : > { %1529 = vmatpush3.bf16.msra.mxu1 %v1771_v10  ;;  %1509 = vmatpush3.bf16.msra.mxu0 %v1777_v13  ;;  %p1984_p1 = pnand %p1983_p11, %p1977_p0 }
  0xd5   : > { %1530 = vmatprep.subr.bf16.mxu1 %v2091_v0  ;;  %1510 = vmatprep.subr.bf16.mxu0 %v2091_v0 }
  0xd8   : > { %1531 = vmatpush3.bf16.msra.mxu1 %v1773_v12  ;;  %1511 = vmatpush3.bf16.msra.mxu0 %v1778_v17 }
  0xd9   : > { %1532 = vmatprep.subr.bf16.mxu1 %v2091_v0  ;;  %1512 = vmatprep.subr.bf16.mxu0 %v2091_v0 }
  0xdc   : > { %1533 = vmatpush3.bf16.msra.mxu1 %v1775_v14  ;;  %1513 = vmatpush3.bf16.msra.mxu0 %v1779_v19 }
  0xdd   : > { %1538 = vmatprep.subr.bf16.mxu0 %v2091_v0 }
  0xdf   : > { %1535 = vmatmul.mubr.bf16.vlgmr.msra.gmra.mrb[0].mxu1 %v2450_v18  ;;  %1515 = vmatmul.mubr.bf16.vlgmr.msra.gmra.mrb[0].mxu0 %v2450_v18 }
  0xe0   : > { %1554 = vmatprep.mubr.msk.bf16.mxu0 %vm2092_vm0, %v2091_v0  ;;  %1539 = vmatpush3.bf16.msra.mxu0 %v1780_v34 }
  0xe1   : > { %1540 = vmatprep.subr.bf16.mxu0 %v2091_v0 }
  0xe4   : > { %1541 = vmatpush3.bf16.msra.mxu0 %v1781_v37 }
  0xe5   : > { %1542 = vmatprep.subr.bf16.mxu0 %v2091_v0 }
  0xe8   : > { %1543 = vmatpush3.bf16.msra.mxu0 %v1782_v42 }
  0xe9   : > { %1544 = vmatprep.subr.bf16.mxu0 %v2091_v0 }
  0xec   : > { %1545 = vmatpush3.bf16.msra.mxu0 %v1783_v47 }
  0xed   : > { %1546 = vmatprep.subr.bf16.mxu0 %v2091_v0 }
  0xf0   : > { %1547 = vmatpush3.bf16.msra.mxu0 %v1784_v50 }
  0xf1   : > { %1548 = vmatprep.subr.bf16.mxu0 %v2091_v0 }
  0xf4   : > { %1549 = vmatpush3.bf16.msra.mxu0 %v1785_v53 }
  0xf5   : > { %1550 = vmatprep.subr.bf16.mxu0 %v2091_v0 }
  0xf8   : > { %1551 = vmatpush3.bf16.msra.mxu0 %v1786_v55 }
  0xf9   : > { %1552 = vmatprep.subr.bf16.mxu0 %v2091_v0 }
  0xfc   : > { %1553 = vmatpush3.bf16.msra.mxu0 %v1787_v57 }
  0xff   : > { %1555 = vmatmul.mubr.bf16.vlgmr.msra.gmra.mrb[4].mxu0 %v2450_v18 }
 0x1b2   : > { %v582_v20 = vpop.f32.mrb[0].mxu1  ;;  %v477_v25 = vpop.f32.mrb[0].mxu0 }
 0x1b3   : > { %v1536_v21 = vpop.f32.mrb[1].mxu1  ;;  %v694_v27 = vmul.f32 0.17677669, %v477_v25  ;;  %v1516_v28 = vpop.f32.mrb[1].mxu0 }
 0x1b4   : > { %v585_v22 = vpop.f32.mrb[2].mxu1  ;;  %v480_v29 = vpop.f32.mrb[2].mxu0 }
 0x1b5   : > { %v704_v23 = vpack.c.bf16 %v585_v22, %v582_v20  ;;  %v1537_v24 = vpop.f32.mrb[3].mxu1  ;;  %v695_v30 = vmul.f32 0.17677669, %v480_v29  ;;  %v1517_v31 = vpop.f32.mrb[3].mxu0  ;;  %v843_v20 = vsub.s32 0, %v2467_v36 }
 0x1b7   : > { %710 = vrot.lane.b32.xlu1 %v704_v23, %s2093_s3  ;;  %706 = vrot.lane.b32.xlu0 %v704_v23, %s2094_s11  ;;  %v737_v26 = vsel %vm723_vm1, %v704_v23, 0  ;;  %v696_v32 = vpack.c.bf16 %v695_v30, %v694_v27 }
 0x1b8   : > { %1610 = vmatprep.subr.msk.bf16.mxu1 %vm723_vm1, %v704_v23 }
 0x1b9   : > { %1559 = vmatpush3.bf16.xpose.msra.mxu1 %v737_v26  ;;  %1566 = vmatprep.mubr.msk.bf16.mxu1 %vm723_vm1, %v696_v32 }
 0x1bb   : > { %708 = vrot.lane.b32.xlu0 %v704_v23, %s2095_s13  ;;  %698 = vrot.lane.b32.xlu1 %v696_v32, %s2094_s11 }
 0x1bf   : > { %700 = vrot.lane.b32.xlu0 %v696_v32, %s2095_s13  ;;  %702 = vrot.lane.b32.xlu1 %v696_v32, %s2093_s3 }
 0x1c3   : > { %846 = vperm.xlu0 %1747, %v816_v39   ;;  %849 = vperm.xlu1 %1748, %v817_v41  }
 0x1c7   : > { %855 = vperm.xlu0 %1747, %v819_v45   ;;  %852 = vperm.xlu1 %1748, %v818_v43  }
 0x1cb   : > { %832 = vrot.lane.b32.xlu0 %v828_v46, %s2093_s3  ;;  %830 = vrot.lane.b32.xlu1 %v827_v48, %s2097_s15 }
 0x1cf   : > { %858 = vperm.xlu0 %1747, %v820_v49   ;;  %834 = vrot.lane.b32.xlu1 %v829_v51, %s2098_s12  ;;  %s1236_s12 = scalar_lea.sflag [#allocation4], %s2403_s7 }
 0x1d2   : > { %v687_v4 = vpop.f32.mrb[4].mxu0 }
 0x1d3   : > { %864 = vperm.xlu0 %1747, %v822_v52   ;;  %861 = vperm.xlu1 %1748, %v821_v54   ;;  %v1556_v5 = vpop.f32.mrb[5].mxu0 }
 0x1d4   : > { %v690_v6 = vpop.f32.mrb[6].mxu0 }
 0x1d5   : > { %v2497_v7 = vpack.c.bf16 %v690_v6, %v687_v4  ;;  %v1557_v8 = vpop.f32.mrb[7].mxu0 }
 0x1d7   : > { %867 = vperm.xlu1 %1748, %v823_v56   ;;  %1574 = vmatprep.subr.bf16.mxu0 %v2497_v7 }
 0x1d8   : > { %1575 = vmatpush3.bf16.msra.mxu0 %v2497_v7 }
 0x229   : > { %v707_v58 = vpop.permute.xlu0 %706  ;;  %v711_v62 = vpop.permute.xlu1 %710 }
 0x22a   : > { %v740_v59 = vsel %vm723_vm1, %v707_v58, 0  ;;  %1611 = vmatprep.subr.msk.bf16.mxu1 %vm723_vm1, %v707_v58  ;;  %v746_v63 = vsel %vm723_vm1, %v711_v62, 0 }
 0x22b   : > { %1561 = vmatpush3.bf16.xpose.msra.mxu1 %v740_v59 }
 0x22d   : > { %v709_v60 = vpop.permute.xlu0 %708  ;;  %v699_v1 = vpop.permute.xlu1 %698 }
 0x22e   : > { %1612 = vmatprep.subr.msk.bf16.mxu1 %vm723_vm1, %v709_v60  ;;  %v743_v61 = vsel %vm723_vm1, %v709_v60, 0 }
 0x231   : > { %v701_v2 = vpop.permute.xlu0 %700  ;;  %v703_v3 = vpop.permute.xlu1 %702 }
 0x233   : > { %1563 = vmatpush3.bf16.xpose.msra.mxu1 %v743_v61 }
 0x234   : > { %1613 = vmatprep.subr.msk.bf16.mxu1 %vm723_vm1, %v711_v62 }
 0x23b   : > { %1565 = vmatpush3.bf16.xpose.msra.mxu1 %v746_v63 }
 0x23c   : > { %1590 = vmatprep.subr.bf16.mxu1 %v2091_v0 }
 0x242   : > { %1567 = vmatmul.mubr.msk.bf16.vlgmr.msra.gmra.mrb[4].mxu1 %vm723_vm1, %v699_v1  ;;  %v850_v9 = vpop.permute.xlu1 %849  ;;  %v847_v10 = vpop.permute.xlu0 %846 }
 0x243   : > { %1570 = vmatprep.mubr.msk.bf16.mxu1 %vm723_vm1, %v701_v2 }
 0x246   : > { %v853_v11 = vpop.permute.xlu1 %852  ;;  %v856_v12 = vpop.permute.xlu0 %855 }
 0x24a   : > { %1571 = vmatmul.mubr.msk.bf16.gmra.mrb[8].mxu1 %vm723_vm1, %v703_v3  ;;  %v831_v13 = vpop.permute.xlu1 %830  ;;  %v833_v17 = vpop.permute.xlu0 %832 }
 0x24b   : > { %1606 = vmatprep.mubr.msk.bf16.mxu1 %vm2092_vm0, %v2091_v0  ;;  %v837_v14 = vsel %vm836_vm2, %v2473_v44, %v831_v13 }
 0x24c   : > { %v838_v18 = vsel %vm723_vm1, %v837_v14, %v833_v17 }
 0x24e   : > { %v835_v19 = vpop.permute.xlu1 %834  ;;  %v859_v23 = vpop.permute.xlu0 %858 }
 0x24f   : > { %v840_v21 = vsel %vm839_vm3, %v838_v18, %v835_v19 }
 0x250   : > { %v844_v22 = vrot.slane %v840_v21, %v843_v20 }
 0x252   : > { %vm871_vm4 = vcmp.gt.s32.totalorder %v844_v22, %v853_v11  ;;  %v862_v25 = vpop.permute.xlu1 %861  ;;  %vm869_vm6 = vcmp.gt.s32.totalorder %v844_v22, %v847_v10  ;;  %vm872_vm7 = vcmp.gt.s32.totalorder %v844_v22, %v856_v12  ;;  %vm870_vm8 = vcmp.gt.s32.totalorder %v844_v22, %v850_v9  ;;  %v865_v34 = vpop.permute.xlu0 %864 }
 0x253   : > { %vm875_vm9 = vcmp.gt.s32.totalorder %v844_v22, %v865_v34  ;;  %vm873_vm10 = vcmp.gt.s32.totalorder %v844_v22, %v859_v23  ;;  %vm874_vm12 = vcmp.gt.s32.totalorder %v844_v22, %v862_v25 }
 0x256   : > { %v868_v36 = vpop.permute.xlu1 %867 }
 0x257   : > { %vm876_vm11 = vcmp.gt.s32.totalorder %v844_v22, %v868_v36 }
 0x315   : > { %v1568_v24 = vpop.f32.mrb[4].mxu1 }
 0x316   : > { %v879_v26 = vsel %vm871_vm4, -1e+20, %v1568_v24  ;;  %v782_v27 = vpop.f32.mrb[5].mxu1 }
 0x317   : > { %v877_v28 = vsel %vm869_vm6, -1e+20, %v782_v27  ;;  %v1569_v29 = vpop.f32.mrb[6].mxu1  ;;  %v892_v37 = vsel %vm885_vm5, %v879_v26, -inf }
 0x318   : > { %v880_v30 = vsel %vm872_vm7, -1e+20, %v1569_v29  ;;  %v785_v31 = vpop.f32.mrb[7].mxu1  ;;  %v886_v32 = vsel %vm885_vm5, %v877_v28, -inf }
 0x319   : > { %v878_v33 = vsel %vm870_vm8, -1e+20, %v785_v31  ;;  %887 = vmax.xlane.f32.xlu0 %v886_v32  ;;  %v895_v45 = vsel %vm885_vm5, %v880_v30, -inf }
 0x31a   : > { %v889_v35 = vsel %vm885_vm5, %v878_v33, -inf }
 0x31b   : > { %890 = vmax.xlane.f32.xlu1 %v889_v35 }
 0x31d   : > { %893 = vmax.xlane.f32.xlu0 %v892_v37  ;;  %v1572_v38 = vpop.f32.mrb[8].mxu1 }
 0x31e   : > { %v883_v39 = vsel %vm875_vm9, -1e+20, %v1572_v38  ;;  %v798_v40 = vpop.f32.mrb[9].mxu1 }
 0x31f   : > { %v881_v41 = vsel %vm873_vm10, -1e+20, %v798_v40  ;;  %v1573_v42 = vpop.f32.mrb[10].mxu1  ;;  %v904_v48 = vsel %vm885_vm5, %v883_v39, -inf }
 0x320   : > { %v884_v43 = vsel %vm876_vm11, -1e+20, %v1573_v42  ;;  %v801_v44 = vpop.f32.mrb[11].mxu1  ;;  %v898_v46 = vsel %vm885_vm5, %v881_v41, -inf }
 0x321   : > { %v882_v47 = vsel %vm874_vm12, -1e+20, %v801_v44  ;;  %896 = vmax.xlane.f32.xlu0 %v895_v45  ;;  %899 = vmax.xlane.f32.xlu1 %v898_v46  ;;  %v907_v50 = vsel %vm885_vm5, %v884_v43, -inf }
 0x322   : > { %v901_v49 = vsel %vm885_vm5, %v882_v47, -inf }
 0x325   : > { %905 = vmax.xlane.f32.xlu1 %v904_v48  ;;  %902 = vmax.xlane.f32.xlu0 %v901_v49 }
 0x329   : > { %908 = vmax.xlane.f32.xlu0 %v907_v50 }
 0x336   : > { %714 = vrot.lane.b32.xlu1 %v2497_v7, %s2094_s11 }
 0x3a6   : > { %v888_v51 = vpop.xlane.xlu0 %887 }
 0x3a7   : > { %v910_v52 = vsub.f32 %v877_v28, %v888_v51 }
 0x3a8   : > { %v891_v53 = vpop.xlane.xlu1 %890 }
 0x3a9   : > { %v918_v56 = vmul.f32 1.442695, %v910_v52  ;;  %v911_v57 = vsub.f32 %v878_v33, %v891_v53 }
 0x3aa   : > { %v894_v54 = vpop.xlane.xlu0 %893 }
 0x3ab   : > { %v912_v55 = vsub.f32 %v879_v26, %v894_v54  ;;  %v920_v62 = vmul.f32 1.442695, %v911_v57 }
 0x3ad   : > { %v922_v58 = vmul.f32 1.442695, %v912_v55 }
 0x3ae   : > { %v897_v59 = vpop.xlane.xlu0 %896  ;;  %v900_v60 = vpop.xlane.xlu1 %899 }
 0x3af   : > { %1796 = vpow2.f32 %v922_v58  ;;  %v913_v61 = vsub.f32 %v880_v30, %v897_v59  ;;  %v914_v1 = vsub.f32 %v881_v41, %v900_v60 }
 0x3b0   : > { %1798 = vpow2.f32 %v918_v56 }
 0x3b1   : > { %v924_v63 = vmul.f32 1.442695, %v913_v61  ;;  %v926_v5 = vmul.f32 1.442695, %v914_v1  ;;  %v1788_v61 = vld [vmem:[#allocation10] sm:$0xff]   ;;  %v1791_v1 = vld [vmem:[#allocation10 + $0x18] sm:$0xff]  }
 0x3b2   : > { %v906_v2 = vpop.xlane.xlu1 %905  ;;  %v903_v3 = vpop.xlane.xlu0 %902  ;;  %1591 = vmatpush3.bf16.msra.mxu1 %v1788_v61 }
 0x3b3   : > { %1800 = vpow2.f32 %v924_v63  ;;  %v916_v4 = vsub.f32 %v883_v39, %v906_v2  ;;  %v915_v8 = vsub.f32 %v882_v47, %v903_v3  ;;  %1592 = vmatprep.subr.bf16.mxu1 %v2091_v0  ;;  %v1790_v63 = vld [vmem:[#allocation10 + $0x10] sm:$0xff]   ;;  %v1792_v2 = vld [vmem:[#allocation10 + $0x20] sm:$0xff]   ;;  %v1793_v3 = vld [vmem:[#allocation10 + $0x28] sm:$0xff]  }
 0x3b4   : > { %1802 = vpow2.f32 %v920_v62  ;;  %v1789_v62 = vld [vmem:[#allocation10 + $0x8] sm:$0xff]  }
 0x3b5   : > { %v930_v6 = vmul.f32 1.442695, %v916_v4  ;;  %v928_v13 = vmul.f32 1.442695, %v915_v8  ;;  %v1794_v4 = vld [vmem:[#allocation10 + $0x30] sm:$0xff]  }
 0x3b6   : > { %v909_v9 = vpop.xlane.xlu0 %908  ;;  %v715_v10 = vpop.permute.xlu1 %714  ;;  %1593 = vmatpush3.bf16.msra.mxu1 %v1789_v62 }
 0x3b7   : > { %1804 = vpow2.f32 %v930_v6  ;;  %v917_v11 = vsub.f32 %v884_v43, %v909_v9  ;;  %1576 = vmatprep.subr.bf16.mxu0 %v715_v10  ;;  %1594 = vmatprep.subr.bf16.mxu1 %v2091_v0 }
 0x3b8   : > { %1577 = vmatpush3.bf16.msra.mxu0 %v715_v10  ;;  %1806 = vpow2.f32 %v926_v5 }
 0x3b9   : > { %v1797_v12 = vpop.eup %1796  ;;  %v932_v14 = vmul.f32 1.442695, %v917_v11  ;;  %v1795_v11 = vld [vmem:[#allocation10 + $0x38] sm:$0xff]  }
 0x3ba   : > { %v940_v17 = vsel %vm885_vm5, %v1797_v12, 0.0  ;;  %v1799_v18 = vpop.eup %1798  ;;  %1595 = vmatpush3.bf16.msra.mxu1 %v1790_v63 }
 0x3bb   : > { %1808 = vpow2.f32 %v932_v14  ;;  %941 = vadd.xlane.f32.xlu1 %v940_v17  ;;  %v934_v21 = vsel %vm885_vm5, %v1799_v18, 0.0  ;;  %1596 = vmatprep.subr.bf16.mxu1 %v2091_v0 }
 0x3bc   : > { %1810 = vpow2.f32 %v928_v13 }
 0x3bd   : > { %v1801_v19 = vpop.eup %1800 }
 0x3be   : > { %v943_v20 = vsel %vm885_vm5, %v1801_v19, 0.0  ;;  %v1803_v22 = vpop.eup %1802  ;;  %1597 = vmatpush3.bf16.msra.mxu1 %v1791_v1 }
 0x3bf   : > { %944 = vadd.xlane.f32.xlu0 %v943_v20  ;;  %935 = vadd.xlane.f32.xlu1 %v934_v21  ;;  %v937_v24 = vsel %vm885_vm5, %v1803_v22, 0.0 }
 0x3c0   : > { %1598 = vmatprep.subr.bf16.mxu1 %v2091_v0 }
 0x3c1   : > { %v1805_v23 = vpop.eup %1804 }
 0x3c2   : > { %v952_v25 = vsel %vm885_vm5, %v1805_v23, 0.0  ;;  %v1807_v26 = vpop.eup %1806  ;;  %1599 = vmatpush3.bf16.msra.mxu1 %v1792_v2 }
 0x3c3   : > { %938 = vadd.xlane.f32.xlu0 %v937_v24  ;;  %953 = vadd.xlane.f32.xlu1 %v952_v25  ;;  %v946_v29 = vsel %vm885_vm5, %v1807_v26, 0.0 }
 0x3c4   : > { %1600 = vmatprep.subr.bf16.mxu1 %v2091_v0 }
 0x3c5   : > { %v1809_v27 = vpop.eup %1808 }
 0x3c6   : > { %v955_v28 = vsel %vm885_vm5, %v1809_v27, 0.0  ;;  %v1811_v30 = vpop.eup %1810  ;;  %1601 = vmatpush3.bf16.msra.mxu1 %v1793_v3 }
 0x3c7   : > { %956 = vadd.xlane.f32.xlu0 %v955_v28  ;;  %947 = vadd.xlane.f32.xlu1 %v946_v29  ;;  %v949_v31 = vsel %vm885_vm5, %v1811_v30, 0.0 }
 0x3c8   : > { %1602 = vmatprep.subr.bf16.mxu1 %v2091_v0 }
 0x3ca   : > { %1603 = vmatpush3.bf16.msra.mxu1 %v1794_v4 }
 0x3cb   : > { %950 = vadd.xlane.f32.xlu0 %v949_v31  ;;  %1604 = vmatprep.subr.bf16.mxu1 %v2091_v0 }
 0x3ce   : > { %1605 = vmatpush3.bf16.msra.mxu1 %v1795_v11 }
 0x3d8   : > { %720 = vrot.lane.b32.xlu1 %v2497_v7, %s2093_s3 }
 0x3e1   : > { %717 = vrot.lane.b32.xlu0 %v2497_v7, %s2095_s13 }
 0x448   : > { %v942_v32 = vpop.xlane.xlu1 %941 }
 0x44c   : > { %v945_v33 = vpop.xlane.xlu0 %944  ;;  %v936_v34 = vpop.xlane.xlu1 %935 }
 0x44d   : > { %1812 = vrcp.f32 %v936_v34 }
 0x450   : > { %v939_v35 = vpop.xlane.xlu0 %938  ;;  %v954_v36 = vpop.xlane.xlu1 %953 }
 0x451   : > { %1814 = vrcp.f32 %v939_v35 }
 0x452   : > { %1816 = vrcp.f32 %v945_v33 }
 0x453   : > { %1818 = vrcp.f32 %v942_v32 }
 0x454   : > { %v957_v37 = vpop.xlane.xlu0 %956  ;;  %v948_v38 = vpop.xlane.xlu1 %947 }
 0x455   : > { %1820 = vrcp.f32 %v948_v38 }
 0x457   : > { %v1813_v40 = vpop.eup %1812 }
 0x458   : > { %v951_v39 = vpop.xlane.xlu0 %950  ;;  %v966_v43 = vmul.f32 %v1813_v40, %v1799_v18  ;;  %v721_v46 = vpop.permute.xlu1 %720 }
 0x459   : > { %1822 = vrcp.f32 %v951_v39 }
 0x45a   : > { %1824 = vrcp.f32 %v957_v37 }
 0x45b   : > { %v1815_v41 = vpop.eup %1814  ;;  %1826 = vrcp.f32 %v954_v36 }
 0x45c   : > { %v1817_v42 = vpop.eup %1816  ;;  %v718_v7 = vpop.permute.xlu0 %717  ;;  %v967_v44 = vmul.f32 %v1815_v41, %v1803_v22 }
 0x45d   : > { %1578 = vmatprep.subr.bf16.mxu0 %v718_v7  ;;  %v1819_v45 = vpop.eup %1818  ;;  %v969_v48 = vmul.f32 %v1817_v42, %v1801_v19 }
 0x45e   : > { %1579 = vmatpush3.bf16.msra.mxu0 %v718_v7  ;;  %v974_v47 = vpack.c.bf16 %v967_v44, %v966_v43  ;;  %v968_v50 = vmul.f32 %v1819_v45, %v1797_v12 }
 0x45f   : > { %1580 = vmatprep.subr.bf16.mxu0 %v721_v46  ;;  %v1821_v49 = vpop.eup %1820 }
 0x460   : > { %1582 = vmatprep.mubr.msk.bf16.mxu0 %vm885_vm5, %v974_v47  ;;  %v975_v52 = vpack.c.bf16 %v969_v48, %v968_v50  ;;  %v970_v54 = vmul.f32 %v1821_v49, %v1807_v26 }
 0x462   : > { %1581 = vmatpush3.bf16.msra.mxu0 %v721_v46 }
 0x463   : > { %v1823_v51 = vpop.eup %1822 }
 0x464   : > { %v1825_v53 = vpop.eup %1824  ;;  %v971_v55 = vmul.f32 %v1823_v51, %v1811_v30 }
 0x465   : > { %1583 = vmatmul.mubr.msk.bf16.vlgmr.msra.gmra.mrb[8].mxu0 %vm885_vm5, %v975_v52  ;;  %v1827_v56 = vpop.eup %1826  ;;  %v973_v58 = vmul.f32 %v1825_v53, %v1809_v27  ;;  %v1438_v53 = vld [vmem:[%s2657_s21] ss:$0 sm:$0xff] }
 0x466   : > { %v976_v57 = vpack.c.bf16 %v971_v55, %v970_v54  ;;  %v972_v59 = vmul.f32 %v1827_v56, %v1805_v23  ;;  %v1439_v55 = vld [vmem:[%s2658_s22] ss:$0 sm:$0xff] }
 0x468   : > { %1586 = vmatprep.mubr.msk.bf16.mxu0 %vm885_vm5, %v976_v57  ;;  %v977_v60 = vpack.c.bf16 %v973_v58, %v972_v59 }
 0x46d   : > { %1587 = vmatmul.mubr.msk.bf16.gmra.mrb[12].mxu0 %vm885_vm5, %v977_v60 }
 0x538   : > { %v1584_v5 = vpop.f32.mrb[8].mxu0 }
 0x539   : > { %v1024_v6 = vpop.f32.mrb[9].mxu0 }
 0x53a   : > { %v1585_v8 = vpop.f32.mrb[10].mxu0 }
 0x53b   : > { %v1749_v9 = vpack.i.bf16 %v1585_v8, %v1584_v5  ;;  %v1027_v10 = vpop.f32.mrb[11].mxu0 }
 0x53d   : > { %1750 = vrot.lane.b32.xlu1 %v1749_v9, %s2093_s3 }
 0x540   : > { %v1588_v12 = vpop.f32.mrb[12].mxu0 }
 0x541   : > { %v1040_v13 = vpop.f32.mrb[13].mxu0 }
 0x542   : > { %v1589_v14 = vpop.f32.mrb[14].mxu0 }
 0x543   : > { %v1759_v17 = vpack.i.bf16 %v1589_v14, %v1588_v12  ;;  %v1043_v18 = vpop.f32.mrb[15].mxu0 }
 0x544   : > { %v1754_v19 = vpack.i.bf16 %v1043_v18, %v1040_v13 }
 0x545   : > { %1760 = vrot.lane.b32.xlu1 %v1759_v17, %s2094_s11 }
 0x546   : > { %1755 = vrot.lane.b32.xlu0 %v1754_v19, %s2095_s13  ;;  %s2659_s13 = sld [smem:[#allocation24_spill]] }
 0x54c   : > { %s2559_s15 = scalar_lea.hbm %s2659_s13, %s1443_s2 }
 0x5af   : > { %v1751_v20 = vpop.permute.xlu1 %1750 }
 0x5b0   : > { %v1753_v21 = vunpack.i.h.bf16 %v1751_v20  ;;  %v1752_v22 = vunpack.i.l.bf16 %v1751_v20 }
 0x5b2   : > { %v1079_v26 = vsel %vm723_vm1, %v1024_v6, %v1752_v22  ;;  %v1080_v27 = vsel %vm723_vm1, %v1027_v10, %v1753_v21 }
 0x5b7   : > { %v1761_v0 = vpop.permute.xlu1 %1760 }
 0x5b8   : > { %v1756_v23 = vpop.permute.xlu0 %1755  ;;  %v1763_v28 = vunpack.i.h.bf16 %v1761_v0  ;;  %v1762_v29 = vunpack.i.l.bf16 %v1761_v0 }
 0x5b9   : > { %v1758_v24 = vunpack.i.h.bf16 %v1756_v23  ;;  %v1757_v25 = vunpack.i.l.bf16 %v1756_v23 }
 0x5bb   : > { %v1082_v30 = vsel %vm885_vm5, %v1080_v27, %v1758_v24  ;;  %v1081_v31 = vsel %vm885_vm5, %v1079_v26, %v1757_v25 }
 0x5bc   : > { %v1085_v32 = vsel %vm1083_vm13, %v1082_v30, %v1763_v28  ;;  %v1084_v33 = vsel %vm1083_vm13, %v1081_v31, %v1762_v29 }
 0x5bd   : > { %v1086_v34 = vpack.c.bf16 %v1085_v32, %v1084_v33 }
 0x5bf   : > { %1607 = vmatmul.mubr.bf16.vlgmr.msra.gmra.mrb[12].mxu1 %v1086_v34 }
 0x692   : > { %v1185_v35 = vpop.f32.mrb[12].mxu1 }
 0x693   : > { %v1186_v36 = vadd.f32 %v1185_v35, %v2441_v15  ;;  %v1608_v37 = vpop.f32.mrb[13].mxu1 }
 0x694   : > { %v1188_v38 = vpop.f32.mrb[14].mxu1 }
 0x695   : > { %v1189_v39 = vadd.f32 %v1188_v38, %v2444_v16  ;;  %1192 = vadd.xlane.f32.xlu0 %v1186_v36  ;;  %v1609_v40 = vpop.f32.mrb[15].mxu1 }
 0x697   : > { %1194 = vadd.xlane.f32.xlu1 %v1189_v39 }
 0x722   : > { %v1193_v41 = vpop.xlane.xlu0 %1192 }
 0x723   : > { %v1197_v42 = vmul.f32 0.0078125, %v1193_v41 }
 0x724   : > { %v1195_v7 = vpop.xlane.xlu1 %1194 }
 0x725   : > { %v1199_v43 = vsub.f32 %v1186_v36, %v1197_v42  ;;  %v1198_v44 = vmul.f32 0.0078125, %v1195_v7 }
 0x727   : > { %v1200_v45 = vsub.f32 %v1189_v39, %v1198_v44  ;;  %v1201_v46 = vmul.f32 %v1199_v43, %v1199_v43 }
 0x729   : > { %1203 = vadd.xlane.f32.xlu0 %v1201_v46  ;;  %v1202_v47 = vmul.f32 %v1200_v45, %v1200_v45 }
 0x72d   : > { %1205 = vadd.xlane.f32.xlu0 %v1202_v47 }
 0x7b6   : > { %v1204_v15 = vpop.xlane.xlu0 %1203 }
 0x7b7   : > { %v1207_v48 = vmul.f32 0.0078125, %v1204_v15 }
 0x7b9   : > { %v1209_v49 = vadd.f32 1e-05, %v1207_v48 }
 0x7ba   : > { %v1206_v50 = vpop.xlane.xlu0 %1205 }
 0x7bb   : > { %1828 = vrsqrt.f32 %v1209_v49  ;;  %v1208_v16 = vmul.f32 0.0078125, %v1206_v50 }
 0x7bd   : > { %v1210_v51 = vadd.f32 1e-05, %v1208_v16 }
 0x7bf   : > { %1830 = vrsqrt.f32 %v1210_v51 }
 0x7c5   : > { %v1829_v52 = vpop.eup %1828 }
 0x7c6   : > { %v1213_v54 = vmul.f32 %v1829_v52, %v1199_v43 }
 0x7c8   : > { %v1222_v56 = vmul.f32 %v1438_v53, %v1213_v54 }
 0x7c9   : > { %v1831_v57 = vpop.eup %1830 }
 0x7ca   : > { %v1231_v58 = vadd.f32 %v1439_v55, %v1222_v56  ;;  %v1214_v59 = vmul.f32 %v1831_v57, %v1200_v45 }
 0x7cc   : > { %v1223_v60 = vmul.f32 %v1438_v53, %v1214_v59  ;;  %1233 = vst [vmem:[%s372_s27] sm:$0xff] %v1231_v58 }
 0x7ce   : > { %v1232_v61 = vadd.f32 %v1439_v55, %v1223_v60 }
 0x7d0   : > { %1234 = vst [vmem:[%s372_s27 + $0x8] sm:$0xff] %v1232_v61 }
 0x7d1   : > { %1987 = shalt.err (!%p1984_p1)
}
 0x7d2   : > { %s1988_s19 = scalar_lea.hbm %s2559_s15, 256  ;;  %s1992_s14 = scalar_lea.hbm %s2659_s13, 2048 }
 0x7d3   : > { %p1989_p12 = scmp.ne.s32.totalorder %s2559_s15, %s1988_s19  ;;  %p1993_p13 = scmp.lt.u32.totalorder %s2559_s15, %s2659_s13 }
 0x7d4   : > { %p1994_p4 = scmp.lt.u32.totalorder %s1992_s14, %s1988_s19  ;;  %p1996_p6 = scmp.lt.u32.totalorder %s1988_s19, %s2559_s15 }
 0x7d5   : > { %p1990_p2 = pnand %p1989_p12, %p2342_p3 }
 0x7d6   : > { %p1995_p9 = por %p1994_p4, %p1993_p13 }
 0x7d7   : > { %p1991_p8 = pneg %p1990_p2 }
 0x7d8   : > { %p1997_p10 = por %p1996_p6, %p1995_p9 }
 0x7da   : > { %p1998_p0 = pnand %p1997_p10, %p1991_p8 }
 0x7dc   : > { %2001 = shalt.err (!%p1998_p0)
}
 0x7dd   : > { %s2100_s5 = smov 128   ;;  %s2101_s2 = smov 8  }
 0x7de   : > { %1632 = dma.vmem_to_hbm [thread:$0]  (%p2342_p3), %s2561_s10, 256, %s2559_s15, %s1236_s12, %s2100_s5, %s2100_s5, %s2101_s2  }
 0x7df PF: > { %s2660_s27 = sld [smem:[#allocation16_spill]]  ;;  %s2661_s3 = sld [smem:[#allocation18_spill]] }
 0x7e0   : > { %p1664_p5 = scmp.ge.s32.totalorder %s2080_s8, 2 }
 0x7e5   : > { %s1266_s11 = sand.u32 1, %s2660_s27   ;;  %p2662_p7 = scmp.ne.s32.totalorder %s2661_s3, 0 }
 0x7e6   : > { %s1267_s28 = scalar_lea.sflag [#allocation4], %s1266_s11 }
 0x7e7   : > { %p1652_p11 = pnand %p1664_p5, %p2662_p7 }
 0x7e9   : > { %2047 = dma.done.wait (!%p1652_p11), %s1267_s28, 256  }
 0x7ea   : > { %2049 = vsyncadd (!%p1652_p11), %s1267_s28, 4294967040  ;;  %s25_s8 = sadd.s32 1, %s2080_s8   ;;  %s2663_s23 = smov %s2672_s24 }
 0x7eb   : > { %p22_p1 = scmp.ge.s32.totalorder %s25_s8, 10   ;;  %s2664_s24 = smov %s2056_s25 }
 0x7ec   : > { %s2665_s25 = smov %s2060_s26  ;;  %s2666_s26 = smov %s2355_s20 }
 0x7ed   : > { %s2667_s27 = smov %s2072_s29  ;;  %s2668_s28 = smov %s2076_s30 }
 0x7ee   : > { %s2669_s29 = smov %s2663_s23  ;;  %s2670_s30 = smov %s2676_s18 }
 0x7ef   :  { %24 = sbr.rel (!%p22_p1) target bundleno = 16 (0x10), region = 109 }
 0x7f6   :  { %1272 = vsyncpa [#allocation3], 1 }
 0x7f7   :  { %1274 = vsyncpa [#allocation3 + $0x1], 1 }
 0x7f8   :  { %1275 = vsyncpa [#allocation6], 1 }
 0x7f9   :  { %1276 = vsyncpa [#allocation9], 1 }
 0x7fa   :  { %1277 = vsyncpa [#allocation4], 1 }
 0x7fb   :  { %1279 = vsyncpa [#allocation4 + $0x1], 1 }

</bundles_post_ra>
